<compile_context>
chip_gen: v5e
topology: v5e:2x2
jax: 0.10.0
libtpu: 0.0.40
codegen_flags: <defaults>
</compile_context>

<pallas_src>
import functools

import jax
import jax.numpy as jnp
from jax.experimental import pallas as pl
from jax.experimental.pallas import tpu as pltpu


def _embed_gather_kernel(ids_ref, table_ref, out_ref, gather_buf, sems, *,
                         block_tokens):
    """Gather `block_tokens` embedding rows for grid step pl.program_id(0).

    ids_ref    : SMEM (padded_tokens,) int32   -- scalar-prefetched token ids
    table_ref  : HBM  (vocab, d_model)         -- memory_space=pl.ANY (no auto-DMA)
    out_ref    : VMEM (block_tokens, d_model)  -- pipelined output block
    gather_buf : VMEM (block_tokens, d_model)  -- DMA landing buffer
    sems       : DMA semaphores, one per in-flight row copy
    """
    base = pl.program_id(0) * block_tokens

    # Issue all row-gather DMAs (HBM table row -> VMEM scratch row), keeping
    # them all in flight, then wait for completion.
    copies = []
    for j in range(block_tokens):                      # static unroll
        tok = ids_ref[base + j]
        cp = pltpu.make_async_copy(
            table_ref.at[pl.ds(tok, 1), :],
            gather_buf.at[pl.ds(j, 1), :],
            sems.at[j],
        )
        cp.start()
        copies.append(cp)
    for cp in copies:
        cp.wait()

    # Lane-dense store of the assembled block to the pipelined output.
    out_ref[...] = gather_buf[...]


def embedder_forward(ids, table, *, block_tokens=32):
    """Embedding lookup: ids (...,) int -> (..., d_model).

    ids   : integer array of token ids, any leading shape (e.g. (batch, seq)).
    table : (vocab_size, d_model) embedding weights.
    """
    vocab_size, d_model = table.shape
    del vocab_size  # only needed for the caller's id range
    orig_shape = ids.shape
    ids_flat = ids.reshape(-1).astype(jnp.int32)
    tokens = ids_flat.shape[0]

    # block_tokens must be a sublane multiple for the output BlockSpec.
    assert block_tokens % 8 == 0, "block_tokens must be a multiple of 8"

    num_blocks = (tokens + block_tokens - 1) // block_tokens
    padded_tokens = num_blocks * block_tokens
    if padded_tokens != tokens:
        # Only the tiny int32 id vector is padded (padded slots gather row 0
        # and are sliced off below).  The data tensor is never padded.
        ids_flat = jnp.pad(ids_flat, (0, padded_tokens - tokens))

    # TODO(synk): for very large batch*seq the full id vector lives in SMEM;
    # chunk across multiple pallas_call invocations if it exceeds SMEM limits.

    kernel = functools.partial(_embed_gather_kernel, block_tokens=block_tokens)

    out = pl.pallas_call(
        kernel,
        out_shape=jax.ShapeDtypeStruct((padded_tokens, d_model), table.dtype),
        grid_spec=pltpu.PrefetchScalarGridSpec(
            num_scalar_prefetch=1,                     # ids -> SMEM
            grid=(num_blocks,),
            in_specs=[pl.BlockSpec(memory_space=pl.ANY)],   # table stays in HBM
            out_specs=pl.BlockSpec((block_tokens, d_model),
                                   lambda i, ids: (i, 0)),
            scratch_shapes=[
                pltpu.VMEM((block_tokens, d_model), table.dtype),
                pltpu.SemaphoreType.DMA((block_tokens,)),
            ],
        ),
        compiler_params=pltpu.CompilerParams(
            dimension_semantics=("parallel",),
            vmem_limit_bytes=32 * 1024 * 1024,
        ),
    )(ids_flat, table)

    return out[:tokens].reshape(*orig_shape, d_model)


if __name__ == "__main__":
    vocab_size, d_model = 64, 128
    batch, seq = 2, 8

    key = jax.random.PRNGKey(0)
    k_ids, k_tab = jax.random.split(key)
    ids = jax.random.randint(k_ids, (batch, seq), 0, vocab_size, dtype=jnp.int32)
    # torch.nn.Embedding default init: weights ~ N(0, 1).
    table = jax.random.normal(k_tab, (vocab_size, d_model), dtype=jnp.float32)

    out = embedder_forward(ids, table, block_tokens=8)
    out = jax.block_until_ready(out)

    # Pure-JAX reference (exact gather).
    ref = jnp.take(table, ids.reshape(-1), axis=0).reshape(batch, seq, d_model)
    assert out.shape == (batch, seq, d_model)
    assert jnp.array_equal(out, ref), "mismatch vs reference"

    print("KERNEL_OK")
</pallas_src>

<mosaic_0001>
module attributes {stable_mosaic.version = 11 : i64} {
  func.func @_embed_gather_kernel(%arg0: i32, %arg1: memref<16xi32, #tpu.memory_space<smem>>, %arg2: memref<64x128xf32, #tpu.memory_space<any>>, %arg3: memref<8x128xf32, #tpu.memory_space<vmem>>, %arg4: memref<8x128xf32, #tpu.memory_space<vmem>>, %arg5: memref<8x!tpu.dma_semaphore, #tpu.memory_space<semaphore_mem>>) attributes {dimension_semantics = [#tpu.dimension_semantics<parallel>], iteration_bounds = array<i64: 2>, scalar_prefetch = 1 : i64, scratch_operands = 2 : i64, tpu.core_type = #tpu.core_type<tc>, window_params = [{}, {transform_indices = @transform_1, window_bounds = array<i64: 8, 128>}]} {
    %c8_i32 = arith.constant 8 : i32
    %0 = arith.muli %arg0, %c8_i32 : i32
    %c0_i32 = arith.constant 0 : i32
    %1 = arith.addi %0, %c0_i32 : i32
    %2 = arith.index_cast %1 : i32 to index
    %3 = memref.load %arg1[%2] : memref<16xi32, #tpu.memory_space<smem>>
    %c0_i32_0 = arith.constant 0 : i32
    %c0_i32_1 = arith.constant 0 : i32
    %4 = tpu.memref_slice %arg2[%3, %c0_i32_1] : memref<64x128xf32, #tpu.memory_space<any>> -> memref<1x128xf32, #tpu.memory_space<any>>
    %c0_i32_2 = arith.constant 0 : i32
    %c0_i32_3 = arith.constant 0 : i32
    %5 = tpu.memref_slice %arg4[%c0_i32_2, %c0_i32_3] : memref<8x128xf32, #tpu.memory_space<vmem>> -> memref<1x128xf32, #tpu.memory_space<vmem>>
    %6 = tpu.memref_slice %arg5[%c0_i32_0] : memref<8x!tpu.dma_semaphore, #tpu.memory_space<semaphore_mem>> -> memref<1x!tpu.dma_semaphore, #tpu.memory_space<semaphore_mem>>
    %7 = tpu.memref_squeeze %6 : memref<1x!tpu.dma_semaphore, #tpu.memory_space<semaphore_mem>> -> memref<!tpu.dma_semaphore, #tpu.memory_space<semaphore_mem>>
    tpu.enqueue_dma source(%4 : memref<1x128xf32, #tpu.memory_space<any>>) target(%5 : memref<1x128xf32, #tpu.memory_space<vmem>>) target_semaphore(%7 : memref<!tpu.dma_semaphore, #tpu.memory_space<semaphore_mem>>)
    %c1_i32 = arith.constant 1 : i32
    %8 = arith.addi %0, %c1_i32 : i32
    %9 = arith.index_cast %8 : i32 to index
    %10 = memref.load %arg1[%9] : memref<16xi32, #tpu.memory_space<smem>>
    %c1_i32_4 = arith.constant 1 : i32
    %c0_i32_5 = arith.constant 0 : i32
    %11 = tpu.memref_slice %arg2[%10, %c0_i32_5] : memref<64x128xf32, #tpu.memory_space<any>> -> memref<1x128xf32, #tpu.memory_space<any>>
    %c1_i32_6 = arith.constant 1 : i32
    %c0_i32_7 = arith.constant 0 : i32
    %12 = tpu.memref_slice %arg4[%c1_i32_6, %c0_i32_7] : memref<8x128xf32, #tpu.memory_space<vmem>> -> memref<1x128xf32, #tpu.memory_space<vmem>>
    %13 = tpu.memref_slice %arg5[%c1_i32_4] : memref<8x!tpu.dma_semaphore, #tpu.memory_space<semaphore_mem>> -> memref<1x!tpu.dma_semaphore, #tpu.memory_space<semaphore_mem>>
    %14 = tpu.memref_squeeze %13 : memref<1x!tpu.dma_semaphore, #tpu.memory_space<semaphore_mem>> -> memref<!tpu.dma_semaphore, #tpu.memory_space<semaphore_mem>>
    tpu.enqueue_dma source(%11 : memref<1x128xf32, #tpu.memory_space<any>>) target(%12 : memref<1x128xf32, #tpu.memory_space<vmem>>) target_semaphore(%14 : memref<!tpu.dma_semaphore, #tpu.memory_space<semaphore_mem>>)
    %c2_i32 = arith.constant 2 : i32
    %15 = arith.addi %0, %c2_i32 : i32
    %16 = arith.index_cast %15 : i32 to index
    %17 = memref.load %arg1[%16] : memref<16xi32, #tpu.memory_space<smem>>
    %c2_i32_8 = arith.constant 2 : i32
    %c0_i32_9 = arith.constant 0 : i32
    %18 = tpu.memref_slice %arg2[%17, %c0_i32_9] : memref<64x128xf32, #tpu.memory_space<any>> -> memref<1x128xf32, #tpu.memory_space<any>>
    %c2_i32_10 = arith.constant 2 : i32
    %c0_i32_11 = arith.constant 0 : i32
    %19 = tpu.memref_slice %arg4[%c2_i32_10, %c0_i32_11] : memref<8x128xf32, #tpu.memory_space<vmem>> -> memref<1x128xf32, #tpu.memory_space<vmem>>
    %20 = tpu.memref_slice %arg5[%c2_i32_8] : memref<8x!tpu.dma_semaphore, #tpu.memory_space<semaphore_mem>> -> memref<1x!tpu.dma_semaphore, #tpu.memory_space<semaphore_mem>>
    %21 = tpu.memref_squeeze %20 : memref<1x!tpu.dma_semaphore, #tpu.memory_space<semaphore_mem>> -> memref<!tpu.dma_semaphore, #tpu.memory_space<semaphore_mem>>
    tpu.enqueue_dma source(%18 : memref<1x128xf32, #tpu.memory_space<any>>) target(%19 : memref<1x128xf32, #tpu.memory_space<vmem>>) target_semaphore(%21 : memref<!tpu.dma_semaphore, #tpu.memory_space<semaphore_mem>>)
    %c3_i32 = arith.constant 3 : i32
    %22 = arith.addi %0, %c3_i32 : i32
    %23 = arith.index_cast %22 : i32 to index
    %24 = memref.load %arg1[%23] : memref<16xi32, #tpu.memory_space<smem>>
    %c3_i32_12 = arith.constant 3 : i32
    %c0_i32_13 = arith.constant 0 : i32
    %25 = tpu.memref_slice %arg2[%24, %c0_i32_13] : memref<64x128xf32, #tpu.memory_space<any>> -> memref<1x128xf32, #tpu.memory_space<any>>
    %c3_i32_14 = arith.constant 3 : i32
    %c0_i32_15 = arith.constant 0 : i32
    %26 = tpu.memref_slice %arg4[%c3_i32_14, %c0_i32_15] : memref<8x128xf32, #tpu.memory_space<vmem>> -> memref<1x128xf32, #tpu.memory_space<vmem>>
    %27 = tpu.memref_slice %arg5[%c3_i32_12] : memref<8x!tpu.dma_semaphore, #tpu.memory_space<semaphore_mem>> -> memref<1x!tpu.dma_semaphore, #tpu.memory_space<semaphore_mem>>
    %28 = tpu.memref_squeeze %27 : memref<1x!tpu.dma_semaphore, #tpu.memory_space<semaphore_mem>> -> memref<!tpu.dma_semaphore, #tpu.memory_space<semaphore_mem>>
    tpu.enqueue_dma source(%25 : memref<1x128xf32, #tpu.memory_space<any>>) target(%26 : memref<1x128xf32, #tpu.memory_space<vmem>>) target_semaphore(%28 : memref<!tpu.dma_semaphore, #tpu.memory_space<semaphore_mem>>)
    %c4_i32 = arith.constant 4 : i32
    %29 = arith.addi %0, %c4_i32 : i32
    %30 = arith.index_cast %29 : i32 to index
    %31 = memref.load %arg1[%30] : memref<16xi32, #tpu.memory_space<smem>>
    %c4_i32_16 = arith.constant 4 : i32
    %c0_i32_17 = arith.constant 0 : i32
    %32 = tpu.memref_slice %arg2[%31, %c0_i32_17] : memref<64x128xf32, #tpu.memory_space<any>> -> memref<1x128xf32, #tpu.memory_space<any>>
    %c4_i32_18 = arith.constant 4 : i32
    %c0_i32_19 = arith.constant 0 : i32
    %33 = tpu.memref_slice %arg4[%c4_i32_18, %c0_i32_19] : memref<8x128xf32, #tpu.memory_space<vmem>> -> memref<1x128xf32, #tpu.memory_space<vmem>>
    %34 = tpu.memref_slice %arg5[%c4_i32_16] : memref<8x!tpu.dma_semaphore, #tpu.memory_space<semaphore_mem>> -> memref<1x!tpu.dma_semaphore, #tpu.memory_space<semaphore_mem>>
    %35 = tpu.memref_squeeze %34 : memref<1x!tpu.dma_semaphore, #tpu.memory_space<semaphore_mem>> -> memref<!tpu.dma_semaphore, #tpu.memory_space<semaphore_mem>>
    tpu.enqueue_dma source(%32 : memref<1x128xf32, #tpu.memory_space<any>>) target(%33 : memref<1x128xf32, #tpu.memory_space<vmem>>) target_semaphore(%35 : memref<!tpu.dma_semaphore, #tpu.memory_space<semaphore_mem>>)
    %c5_i32 = arith.constant 5 : i32
    %36 = arith.addi %0, %c5_i32 : i32
    %37 = arith.index_cast %36 : i32 to index
    %38 = memref.load %arg1[%37] : memref<16xi32, #tpu.memory_space<smem>>
    %c5_i32_20 = arith.constant 5 : i32
    %c0_i32_21 = arith.constant 0 : i32
    %39 = tpu.memref_slice %arg2[%38, %c0_i32_21] : memref<64x128xf32, #tpu.memory_space<any>> -> memref<1x128xf32, #tpu.memory_space<any>>
    %c5_i32_22 = arith.constant 5 : i32
    %c0_i32_23 = arith.constant 0 : i32
    %40 = tpu.memref_slice %arg4[%c5_i32_22, %c0_i32_23] : memref<8x128xf32, #tpu.memory_space<vmem>> -> memref<1x128xf32, #tpu.memory_space<vmem>>
    %41 = tpu.memref_slice %arg5[%c5_i32_20] : memref<8x!tpu.dma_semaphore, #tpu.memory_space<semaphore_mem>> -> memref<1x!tpu.dma_semaphore, #tpu.memory_space<semaphore_mem>>
    %42 = tpu.memref_squeeze %41 : memref<1x!tpu.dma_semaphore, #tpu.memory_space<semaphore_mem>> -> memref<!tpu.dma_semaphore, #tpu.memory_space<semaphore_mem>>
    tpu.enqueue_dma source(%39 : memref<1x128xf32, #tpu.memory_space<any>>) target(%40 : memref<1x128xf32, #tpu.memory_space<vmem>>) target_semaphore(%42 : memref<!tpu.dma_semaphore, #tpu.memory_space<semaphore_mem>>)
    %c6_i32 = arith.constant 6 : i32
    %43 = arith.addi %0, %c6_i32 : i32
    %44 = arith.index_cast %43 : i32 to index
    %45 = memref.load %arg1[%44] : memref<16xi32, #tpu.memory_space<smem>>
    %c6_i32_24 = arith.constant 6 : i32
    %c0_i32_25 = arith.constant 0 : i32
    %46 = tpu.memref_slice %arg2[%45, %c0_i32_25] : memref<64x128xf32, #tpu.memory_space<any>> -> memref<1x128xf32, #tpu.memory_space<any>>
    %c6_i32_26 = arith.constant 6 : i32
    %c0_i32_27 = arith.constant 0 : i32
    %47 = tpu.memref_slice %arg4[%c6_i32_26, %c0_i32_27] : memref<8x128xf32, #tpu.memory_space<vmem>> -> memref<1x128xf32, #tpu.memory_space<vmem>>
    %48 = tpu.memref_slice %arg5[%c6_i32_24] : memref<8x!tpu.dma_semaphore, #tpu.memory_space<semaphore_mem>> -> memref<1x!tpu.dma_semaphore, #tpu.memory_space<semaphore_mem>>
    %49 = tpu.memref_squeeze %48 : memref<1x!tpu.dma_semaphore, #tpu.memory_space<semaphore_mem>> -> memref<!tpu.dma_semaphore, #tpu.memory_space<semaphore_mem>>
    tpu.enqueue_dma source(%46 : memref<1x128xf32, #tpu.memory_space<any>>) target(%47 : memref<1x128xf32, #tpu.memory_space<vmem>>) target_semaphore(%49 : memref<!tpu.dma_semaphore, #tpu.memory_space<semaphore_mem>>)
    %c7_i32 = arith.constant 7 : i32
    %50 = arith.addi %0, %c7_i32 : i32
    %51 = arith.index_cast %50 : i32 to index
    %52 = memref.load %arg1[%51] : memref<16xi32, #tpu.memory_space<smem>>
    %c7_i32_28 = arith.constant 7 : i32
    %c0_i32_29 = arith.constant 0 : i32
    %53 = tpu.memref_slice %arg2[%52, %c0_i32_29] : memref<64x128xf32, #tpu.memory_space<any>> -> memref<1x128xf32, #tpu.memory_space<any>>
    %c7_i32_30 = arith.constant 7 : i32
    %c0_i32_31 = arith.constant 0 : i32
    %54 = tpu.memref_slice %arg4[%c7_i32_30, %c0_i32_31] : memref<8x128xf32, #tpu.memory_space<vmem>> -> memref<1x128xf32, #tpu.memory_space<vmem>>
    %55 = tpu.memref_slice %arg5[%c7_i32_28] : memref<8x!tpu.dma_semaphore, #tpu.memory_space<semaphore_mem>> -> memref<1x!tpu.dma_semaphore, #tpu.memory_space<semaphore_mem>>
    %56 = tpu.memref_squeeze %55 : memref<1x!tpu.dma_semaphore, #tpu.memory_space<semaphore_mem>> -> memref<!tpu.dma_semaphore, #tpu.memory_space<semaphore_mem>>
    tpu.enqueue_dma source(%53 : memref<1x128xf32, #tpu.memory_space<any>>) target(%54 : memref<1x128xf32, #tpu.memory_space<vmem>>) target_semaphore(%56 : memref<!tpu.dma_semaphore, #tpu.memory_space<semaphore_mem>>)
    %c0_i32_32 = arith.constant 0 : i32
    %c0_i32_33 = arith.constant 0 : i32
    %57 = tpu.memref_slice %arg2[%3, %c0_i32_33] : memref<64x128xf32, #tpu.memory_space<any>> -> memref<1x128xf32, #tpu.memory_space<any>>
    %c0_i32_34 = arith.constant 0 : i32
    %c0_i32_35 = arith.constant 0 : i32
    %58 = tpu.memref_slice %arg4[%c0_i32_34, %c0_i32_35] : memref<8x128xf32, #tpu.memory_space<vmem>> -> memref<1x128xf32, #tpu.memory_space<vmem>>
    %59 = tpu.memref_slice %arg5[%c0_i32_32] : memref<8x!tpu.dma_semaphore, #tpu.memory_space<semaphore_mem>> -> memref<1x!tpu.dma_semaphore, #tpu.memory_space<semaphore_mem>>
    %60 = tpu.memref_squeeze %59 : memref<1x!tpu.dma_semaphore, #tpu.memory_space<semaphore_mem>> -> memref<!tpu.dma_semaphore, #tpu.memory_space<semaphore_mem>>
    tpu.wait_dma2 semaphore(%60 : memref<!tpu.dma_semaphore, #tpu.memory_space<semaphore_mem>>) src(%57 : memref<1x128xf32, #tpu.memory_space<any>>) dst(%58 : memref<1x128xf32, #tpu.memory_space<vmem>>)
    %c1_i32_36 = arith.constant 1 : i32
    %c0_i32_37 = arith.constant 0 : i32
    %61 = tpu.memref_slice %arg2[%10, %c0_i32_37] : memref<64x128xf32, #tpu.memory_space<any>> -> memref<1x128xf32, #tpu.memory_space<any>>
    %c1_i32_38 = arith.constant 1 : i32
    %c0_i32_39 = arith.constant 0 : i32
    %62 = tpu.memref_slice %arg4[%c1_i32_38, %c0_i32_39] : memref<8x128xf32, #tpu.memory_space<vmem>> -> memref<1x128xf32, #tpu.memory_space<vmem>>
    %63 = tpu.memref_slice %arg5[%c1_i32_36] : memref<8x!tpu.dma_semaphore, #tpu.memory_space<semaphore_mem>> -> memref<1x!tpu.dma_semaphore, #tpu.memory_space<semaphore_mem>>
    %64 = tpu.memref_squeeze %63 : memref<1x!tpu.dma_semaphore, #tpu.memory_space<semaphore_mem>> -> memref<!tpu.dma_semaphore, #tpu.memory_space<semaphore_mem>>
    tpu.wait_dma2 semaphore(%64 : memref<!tpu.dma_semaphore, #tpu.memory_space<semaphore_mem>>) src(%61 : memref<1x128xf32, #tpu.memory_space<any>>) dst(%62 : memref<1x128xf32, #tpu.memory_space<vmem>>)
    %c2_i32_40 = arith.constant 2 : i32
    %c0_i32_41 = arith.constant 0 : i32
    %65 = tpu.memref_slice %arg2[%17, %c0_i32_41] : memref<64x128xf32, #tpu.memory_space<any>> -> memref<1x128xf32, #tpu.memory_space<any>>
    %c2_i32_42 = arith.constant 2 : i32
    %c0_i32_43 = arith.constant 0 : i32
    %66 = tpu.memref_slice %arg4[%c2_i32_42, %c0_i32_43] : memref<8x128xf32, #tpu.memory_space<vmem>> -> memref<1x128xf32, #tpu.memory_space<vmem>>
    %67 = tpu.memref_slice %arg5[%c2_i32_40] : memref<8x!tpu.dma_semaphore, #tpu.memory_space<semaphore_mem>> -> memref<1x!tpu.dma_semaphore, #tpu.memory_space<semaphore_mem>>
    %68 = tpu.memref_squeeze %67 : memref<1x!tpu.dma_semaphore, #tpu.memory_space<semaphore_mem>> -> memref<!tpu.dma_semaphore, #tpu.memory_space<semaphore_mem>>
    tpu.wait_dma2 semaphore(%68 : memref<!tpu.dma_semaphore, #tpu.memory_space<semaphore_mem>>) src(%65 : memref<1x128xf32, #tpu.memory_space<any>>) dst(%66 : memref<1x128xf32, #tpu.memory_space<vmem>>)
    %c3_i32_44 = arith.constant 3 : i32
    %c0_i32_45 = arith.constant 0 : i32
    %69 = tpu.memref_slice %arg2[%24, %c0_i32_45] : memref<64x128xf32, #tpu.memory_space<any>> -> memref<1x128xf32, #tpu.memory_space<any>>
    %c3_i32_46 = arith.constant 3 : i32
    %c0_i32_47 = arith.constant 0 : i32
    %70 = tpu.memref_slice %arg4[%c3_i32_46, %c0_i32_47] : memref<8x128xf32, #tpu.memory_space<vmem>> -> memref<1x128xf32, #tpu.memory_space<vmem>>
    %71 = tpu.memref_slice %arg5[%c3_i32_44] : memref<8x!tpu.dma_semaphore, #tpu.memory_space<semaphore_mem>> -> memref<1x!tpu.dma_semaphore, #tpu.memory_space<semaphore_mem>>
    %72 = tpu.memref_squeeze %71 : memref<1x!tpu.dma_semaphore, #tpu.memory_space<semaphore_mem>> -> memref<!tpu.dma_semaphore, #tpu.memory_space<semaphore_mem>>
    tpu.wait_dma2 semaphore(%72 : memref<!tpu.dma_semaphore, #tpu.memory_space<semaphore_mem>>) src(%69 : memref<1x128xf32, #tpu.memory_space<any>>) dst(%70 : memref<1x128xf32, #tpu.memory_space<vmem>>)
    %c4_i32_48 = arith.constant 4 : i32
    %c0_i32_49 = arith.constant 0 : i32
    %73 = tpu.memref_slice %arg2[%31, %c0_i32_49] : memref<64x128xf32, #tpu.memory_space<any>> -> memref<1x128xf32, #tpu.memory_space<any>>
    %c4_i32_50 = arith.constant 4 : i32
    %c0_i32_51 = arith.constant 0 : i32
    %74 = tpu.memref_slice %arg4[%c4_i32_50, %c0_i32_51] : memref<8x128xf32, #tpu.memory_space<vmem>> -> memref<1x128xf32, #tpu.memory_space<vmem>>
    %75 = tpu.memref_slice %arg5[%c4_i32_48] : memref<8x!tpu.dma_semaphore, #tpu.memory_space<semaphore_mem>> -> memref<1x!tpu.dma_semaphore, #tpu.memory_space<semaphore_mem>>
    %76 = tpu.memref_squeeze %75 : memref<1x!tpu.dma_semaphore, #tpu.memory_space<semaphore_mem>> -> memref<!tpu.dma_semaphore, #tpu.memory_space<semaphore_mem>>
    tpu.wait_dma2 semaphore(%76 : memref<!tpu.dma_semaphore, #tpu.memory_space<semaphore_mem>>) src(%73 : memref<1x128xf32, #tpu.memory_space<any>>) dst(%74 : memref<1x128xf32, #tpu.memory_space<vmem>>)
    %c5_i32_52 = arith.constant 5 : i32
    %c0_i32_53 = arith.constant 0 : i32
    %77 = tpu.memref_slice %arg2[%38, %c0_i32_53] : memref<64x128xf32, #tpu.memory_space<any>> -> memref<1x128xf32, #tpu.memory_space<any>>
    %c5_i32_54 = arith.constant 5 : i32
    %c0_i32_55 = arith.constant 0 : i32
    %78 = tpu.memref_slice %arg4[%c5_i32_54, %c0_i32_55] : memref<8x128xf32, #tpu.memory_space<vmem>> -> memref<1x128xf32, #tpu.memory_space<vmem>>
    %79 = tpu.memref_slice %arg5[%c5_i32_52] : memref<8x!tpu.dma_semaphore, #tpu.memory_space<semaphore_mem>> -> memref<1x!tpu.dma_semaphore, #tpu.memory_space<semaphore_mem>>
    %80 = tpu.memref_squeeze %79 : memref<1x!tpu.dma_semaphore, #tpu.memory_space<semaphore_mem>> -> memref<!tpu.dma_semaphore, #tpu.memory_space<semaphore_mem>>
    tpu.wait_dma2 semaphore(%80 : memref<!tpu.dma_semaphore, #tpu.memory_space<semaphore_mem>>) src(%77 : memref<1x128xf32, #tpu.memory_space<any>>) dst(%78 : memref<1x128xf32, #tpu.memory_space<vmem>>)
    %c6_i32_56 = arith.constant 6 : i32
    %c0_i32_57 = arith.constant 0 : i32
    %81 = tpu.memref_slice %arg2[%45, %c0_i32_57] : memref<64x128xf32, #tpu.memory_space<any>> -> memref<1x128xf32, #tpu.memory_space<any>>
    %c6_i32_58 = arith.constant 6 : i32
    %c0_i32_59 = arith.constant 0 : i32
    %82 = tpu.memref_slice %arg4[%c6_i32_58, %c0_i32_59] : memref<8x128xf32, #tpu.memory_space<vmem>> -> memref<1x128xf32, #tpu.memory_space<vmem>>
    %83 = tpu.memref_slice %arg5[%c6_i32_56] : memref<8x!tpu.dma_semaphore, #tpu.memory_space<semaphore_mem>> -> memref<1x!tpu.dma_semaphore, #tpu.memory_space<semaphore_mem>>
    %84 = tpu.memref_squeeze %83 : memref<1x!tpu.dma_semaphore, #tpu.memory_space<semaphore_mem>> -> memref<!tpu.dma_semaphore, #tpu.memory_space<semaphore_mem>>
    tpu.wait_dma2 semaphore(%84 : memref<!tpu.dma_semaphore, #tpu.memory_space<semaphore_mem>>) src(%81 : memref<1x128xf32, #tpu.memory_space<any>>) dst(%82 : memref<1x128xf32, #tpu.memory_space<vmem>>)
    %c7_i32_60 = arith.constant 7 : i32
    %c0_i32_61 = arith.constant 0 : i32
    %85 = tpu.memref_slice %arg2[%52, %c0_i32_61] : memref<64x128xf32, #tpu.memory_space<any>> -> memref<1x128xf32, #tpu.memory_space<any>>
    %c7_i32_62 = arith.constant 7 : i32
    %c0_i32_63 = arith.constant 0 : i32
    %86 = tpu.memref_slice %arg4[%c7_i32_62, %c0_i32_63] : memref<8x128xf32, #tpu.memory_space<vmem>> -> memref<1x128xf32, #tpu.memory_space<vmem>>
    %87 = tpu.memref_slice %arg5[%c7_i32_60] : memref<8x!tpu.dma_semaphore, #tpu.memory_space<semaphore_mem>> -> memref<1x!tpu.dma_semaphore, #tpu.memory_space<semaphore_mem>>
    %88 = tpu.memref_squeeze %87 : memref<1x!tpu.dma_semaphore, #tpu.memory_space<semaphore_mem>> -> memref<!tpu.dma_semaphore, #tpu.memory_space<semaphore_mem>>
    tpu.wait_dma2 semaphore(%88 : memref<!tpu.dma_semaphore, #tpu.memory_space<semaphore_mem>>) src(%85 : memref<1x128xf32, #tpu.memory_space<any>>) dst(%86 : memref<1x128xf32, #tpu.memory_space<vmem>>)
    %c0 = arith.constant 0 : index
    %c0_64 = arith.constant 0 : index
    %89 = vector.load %arg4[%c0, %c0_64] : memref<8x128xf32, #tpu.memory_space<vmem>>, vector<8x128xf32>
    %c0_65 = arith.constant 0 : index
    %c0_66 = arith.constant 0 : index
    %90 = vector.load %arg3[%c0_65, %c0_66] : memref<8x128xf32, #tpu.memory_space<vmem>>, vector<8x128xf32>
    tpu.vector_store %arg3[%c0_65, %c0_66], %89 {strides = array<i32>} : memref<8x128xf32, #tpu.memory_space<vmem>>, vector<8x128xf32>,
    return
  }
  func.func @transform_1(%arg0: i32, %arg1: memref<16xi32, #tpu.memory_space<smem>>) -> (i32, i32) {
    %c0_i32 = arith.constant 0 : i32
    %c0_i32_0 = arith.constant 0 : i32
    return %arg0, %c0_i32 : i32, i32
  }
}

</mosaic_0001>

<bundles_post_ra>
// kernel: tpu_custom_call.1
= control target key start
LH: loop header
LB: loop body
LE: loop exit
PB: predicated region body
PF: predicated region fallthrough
CT: control target
= control target key end

     0   :  { %s674_s12 = smov [#allocation5]   ;;  %s867_s0 = inlined_call_operand.hbm [shape: s32[16], index: 0, kind: input, shape index: {}]   ;;  %s868_s1 = inlined_call_operand.hbm [shape: f32[64,128], index: 1, kind: input, shape index: {}]   ;;  %s869_s2 = inlined_call_operand.hbm [shape: f32[16,128], index: 2, kind: output, shape index: {}]  }
   0x1   :  { %s8_s11 = sshll.u32 %s867_s0, 4  ;;  %s9_s11 = int_to_ptr.hbm [resolvable:$true] %s8_s11 }
   0x2   :  { %11 = dma.hbm_to_smem %s9_s11, 16, %s674_s12, [#allocation4] }
   0x3   :  { %640 = dma.done.wait [#allocation4], 16 }
   0x4   :  { %641 = vsyncadd [#allocation4], 4294967280 }
   0x5   :  { %14 = sfence }
   0x6   :  { %15 = vsyncpa [#allocation7], 0 }
   0x7   :  { %17 = vsyncpa [#allocation7 + $0x1], 0  ;;  %s701_s13 = smov 0   ;;  %s703_s14 = smov 0  }
   0x8   :  { %s705_s15 = smov 0  }
   0x9 LB: > { %s339_s0 = sadd.s32 4294967295, %s672_s15   ;;  %s718_s16 = sadd.s32 1, %s672_s15   ;;  %s672_s15 = sphi %s705_s15, %s874_s15   ;;  %s668_s14 = sphi %s703_s14, %s873_s14   ;;  %s664_s13 = sphi %s701_s13, %s872_s13  }
   0xa   : > { %s26_s17 = ssub.s32 %s672_s15, %s718_s16  ;;  %s29_s18 = sadd.s32 1, %s668_s14 }
   0xb   : > { %p27_p0 = scmp.eq.s32.totalorder %s26_s17, 0  ;;  %p340_p1 = scmp.ne.s32.totalorder %s26_s17, 0 }
   0xc   : > { %p33_p2 = scmp.eq.s32.totalorder %s672_s15, 1  ;;  %p38_p3 = scmp.ne.s32.totalorder %s668_s14, %s664_s13 }
   0xd   : > { %s727_s19 = scalar_select %p27_p0, %s668_s14, %s29_s18  }
   0xe   : > { %p729_p4 = por %p340_p1, %p33_p2  ;;  %p39_p5 = scmp.eq.s32.totalorder %s339_s0, 1 }
   0xf   : > { %p341_p7 = scmp.ge.s32.totalorder %s672_s15, 2 }
  0x10   : > { %p733_p6 = por %p39_p5, %p38_p3  ;;  %s53_s22 = sand.u32 (!%p341_p7), 1, %s668_s14  }
  0x11   : > { %48 = sbr.rel (%p341_p7) target bundleno = 156 (0x9c), region = 12  ;;  %s740_s23 = sshll.u32 (!%p341_p7), %s672_s15, 3 }
  0x12   : > { %s744_s24 = sshll.u32 (!%p341_p7), %s53_s22, 3  ;;  %s57_s25 = sld [smem:[#allocation5 + %s740_s23]] (!%p341_p7) }
  0x13   : > { %s675_s26 = smov (!%p341_p7), [#allocation2]   ;;  %s72_s28 = sadd.s32 (!%p341_p7), 1, %s740_s23 }
  0x14   : > { %s68_s27 = sshll.u32 (!%p341_p7), %s675_s26, 4  ;;  %s73_s29 = sld [smem:[#allocation5 + %s72_s28]] (!%p341_p7)  ;;  %s69_s27 = int_to_ptr.vmem [resolvable:$true] %s68_s27 }
  0x15   : > { %s90_s30 = sadd.s32 (!%p341_p7), 2, %s740_s23  ;;  %s676_s3 = smov (!%p341_p7), [#allocation2 + $0x1]  }
  0x16   : > { %s749_s4 = sshll.u32 %s676_s3, 4  ;;  %s91_s5 = sld [smem:[#allocation5 + %s90_s30]]  ;;  %s87_s4 = int_to_ptr.vmem [resolvable:$true] %s749_s4 }
  0x17   : > { %s677_s10 = smov [#allocation2 + $0x2]   ;;  %s760_s26 = scalar_lea.hbm %s868_s1, 64 }
  0x18   : > { %s58_s8 = scalar_lea.hbm %s868_s1, %s57_s25  ;;  %s755_s11 = sshll.u32 %s677_s10, 4  ;;  %s105_s11 = int_to_ptr.vmem [resolvable:$true] %s755_s11 }
  0x19   : > { %s66_s9 = sshll.u32 %s58_s8, 4  ;;  %s67_s9 = int_to_ptr.hbm [resolvable:$true] %s66_s9 }
  0x1a   : > { %s408_s12 = sshra.s32 %s67_s9, 4  ;;  %s409_s12 = int_to_ptr.hbm [resolvable:$true] %s408_s12 }
  0x1b   : > { %s410_s0 = scalar_lea.hbm %s409_s12, 1  ;;  %p413_p9 = scmp.lt.s32.totalorder %s409_s12, %s868_s1 }
  0x1c   : > { %p411_p8 = scmp.ne.s32.totalorder %s409_s12, %s410_s0  ;;  %p414_p10 = scmp.lt.s32.totalorder %s760_s26, %s410_s0 }
  0x1e   : > { %p415_p11 = por %p414_p10, %p413_p9 }
  0x20   : > { %p416_p12 = pnand %p415_p11, %p411_p8 }
  0x22   : > { %419 = shalt.err (!%p416_p12)  }
  0x23   : > { %71 = dma.hbm_to_vmem [thread:$0]  %s67_s9, 16, %s69_s27, [#allocation3] }
  0x24   : > { %s74_s6 = scalar_lea.hbm %s868_s1, %s73_s29  ;;  %s92_s17 = scalar_lea.hbm %s868_s1, %s91_s5 }
  0x25   : > { %s84_s7 = sshll.u32 %s74_s6, 4  ;;  %s102_s18 = sshll.u32 %s92_s17, 4  ;;  %s85_s7 = int_to_ptr.hbm [resolvable:$true] %s84_s7  ;;  %s103_s18 = int_to_ptr.hbm [resolvable:$true] %s102_s18 }
  0x26   : > { %s432_s12 = sshra.s32 %s85_s7, 4  ;;  %s433_s12 = int_to_ptr.hbm [resolvable:$true] %s432_s12 }
  0x27   : > { %s434_s0 = scalar_lea.hbm %s433_s12, 1  ;;  %p437_p0 = scmp.lt.s32.totalorder %s433_s12, %s868_s1 }
  0x28   : > { %p435_p13 = scmp.ne.s32.totalorder %s433_s12, %s434_s0  ;;  %p438_p1 = scmp.lt.s32.totalorder %s760_s26, %s434_s0 }
  0x2a   : > { %p439_p2 = por %p438_p1, %p437_p0 }
  0x2c   : > { %p440_p3 = pnand %p439_p2, %p435_p13 }
  0x2e   : > { %443 = shalt.err (!%p440_p3)  }
  0x2f   : > { %89 = dma.hbm_to_vmem [thread:$0]  %s85_s7, 16, %s87_s4, [#allocation3 + $0x1] }
  0x30   : > { %s108_s29 = sadd.s32 3, %s740_s23  ;;  %s456_s5 = sshra.s32 %s103_s18, 4  ;;  %s457_s5 = int_to_ptr.hbm [resolvable:$true] %s456_s5 }
  0x31   : > { %s458_s9 = scalar_lea.hbm %s457_s5, 1  ;;  %p461_p7 = scmp.lt.s32.totalorder %s457_s5, %s868_s1 }
  0x32   : > { %p459_p5 = scmp.ne.s32.totalorder %s457_s5, %s458_s9  ;;  %p462_p8 = scmp.lt.s32.totalorder %s760_s26, %s458_s9 }
  0x34   : > { %p463_p9 = por %p462_p8, %p461_p7 }
  0x36   : > { %p464_p10 = pnand %p463_p9, %p459_p5 }
  0x38   : > { %467 = shalt.err (!%p464_p10)  }
  0x39   : > { %107 = dma.hbm_to_vmem [thread:$0]  %s103_s18, 16, %s105_s11, [#allocation3 + $0x2] }
  0x3a   : > { %s109_s3 = sld [smem:[#allocation5 + %s108_s29]]  ;;  %s678_s6 = smov [#allocation2 + $0x3]  }
  0x3b   : > { %s122_s4 = sshll.u32 %s678_s6, 4  ;;  %s126_s7 = sadd.s32 4, %s740_s23  ;;  %s123_s4 = int_to_ptr.vmem [resolvable:$true] %s122_s4 }
  0x3c   : > { %s127_s8 = sld [smem:[#allocation5 + %s126_s7]]  ;;  %s144_s10 = sadd.s32 5, %s740_s23 }
  0x3d   : > { %s679_s17 = smov [#allocation2 + $0x4]   ;;  %s145_s0 = sld [smem:[#allocation5 + %s144_s10]] }
  0x3e   : > { %s786_s12 = sshll.u32 %s679_s17, 4  ;;  %s680_s18 = smov [#allocation2 + $0x5]   ;;  %s141_s12 = int_to_ptr.vmem [resolvable:$true] %s786_s12 }
  0x3f   : > { %s792_s5 = sshll.u32 %s680_s18, 4  ;;  %s159_s5 = int_to_ptr.vmem [resolvable:$true] %s792_s5 }
  0x40   : > { %s110_s11 = scalar_lea.hbm %s868_s1, %s109_s3 }
  0x41   : > { %s120_s29 = sshll.u32 %s110_s11, 4  ;;  %s121_s29 = int_to_ptr.hbm [resolvable:$true] %s120_s29 }
  0x42   : > { %s128_s25 = scalar_lea.hbm %s868_s1, %s127_s8  ;;  %s480_s6 = sshra.s32 %s121_s29, 4  ;;  %s481_s6 = int_to_ptr.hbm [resolvable:$true] %s480_s6 }
  0x43   : > { %s482_s7 = scalar_lea.hbm %s481_s6, 1  ;;  %p485_p12 = scmp.lt.s32.totalorder %s481_s6, %s868_s1 }
  0x44   : > { %p483_p11 = scmp.ne.s32.totalorder %s481_s6, %s482_s7  ;;  %p486_p13 = scmp.lt.s32.totalorder %s760_s26, %s482_s7 }
  0x46   : > { %p487_p0 = por %p486_p13, %p485_p12 }
  0x48   : > { %p488_p1 = pnand %p487_p0, %p483_p11 }
  0x4a   : > { %491 = shalt.err (!%p488_p1)  }
  0x4b   : > { %125 = dma.hbm_to_vmem [thread:$0]  %s121_s29, 16, %s123_s4, [#allocation3 + $0x3] }
  0x4c   : > { %s138_s3 = sshll.u32 %s128_s25, 4  ;;  %s146_s11 = scalar_lea.hbm %s868_s1, %s145_s0  ;;  %s139_s3 = int_to_ptr.hbm [resolvable:$true] %s138_s3 }
  0x4d   : > { %s156_s8 = sshll.u32 %s146_s11, 4  ;;  %s504_s18 = sshra.s32 %s139_s3, 4  ;;  %s505_s18 = int_to_ptr.hbm [resolvable:$true] %s504_s18  ;;  %s157_s8 = int_to_ptr.hbm [resolvable:$true] %s156_s8 }
  0x4e   : > { %s506_s9 = scalar_lea.hbm %s505_s18, 1  ;;  %p509_p3 = scmp.lt.s32.totalorder %s505_s18, %s868_s1 }
  0x4f   : > { %p507_p2 = scmp.ne.s32.totalorder %s505_s18, %s506_s9  ;;  %p510_p5 = scmp.lt.s32.totalorder %s760_s26, %s506_s9 }
  0x51   : > { %p511_p7 = por %p510_p5, %p509_p3 }
  0x53   : > { %p512_p8 = pnand %p511_p7, %p507_p2 }
  0x55   : > { %515 = shalt.err (!%p512_p8)  }
  0x56   : > { %143 = dma.hbm_to_vmem [thread:$0]  %s139_s3, 16, %s141_s12, [#allocation3 + $0x4] }
  0x57   : > { %s162_s4 = sadd.s32 6, %s740_s23  ;;  %s528_s0 = sshra.s32 %s157_s8, 4  ;;  %s529_s0 = int_to_ptr.hbm [resolvable:$true] %s528_s0 }
  0x58   : > { %s530_s29 = scalar_lea.hbm %s529_s0, 1  ;;  %p533_p10 = scmp.lt.s32.totalorder %s529_s0, %s868_s1 }
  0x59   : > { %p531_p9 = scmp.ne.s32.totalorder %s529_s0, %s530_s29  ;;  %p534_p11 = scmp.lt.s32.totalorder %s760_s26, %s530_s29 }
  0x5b   : > { %p535_p12 = por %p534_p11, %p533_p10 }
  0x5d   : > { %p536_p13 = pnand %p535_p12, %p531_p9 }
  0x5f   : > { %539 = shalt.err (!%p536_p13)  }
  0x60   : > { %161 = dma.hbm_to_vmem [thread:$0]  %s157_s8, 16, %s159_s5, [#allocation3 + $0x5] }
  0x61   : > { %s163_s7 = sld [smem:[#allocation5 + %s162_s4]]  ;;  %s180_s12 = sadd.s32 7, %s740_s23 }
  0x62   : > { %s181_s17 = sld [smem:[#allocation5 + %s180_s12]]  ;;  %s681_s3 = smov [#allocation2 + $0x6]  }
  0x63   : > { %s176_s28 = sshll.u32 %s681_s3, 4  ;;  %s682_s27 = smov [#allocation2 + $0x7]   ;;  %s177_s28 = int_to_ptr.vmem [resolvable:$true] %s176_s28 }
  0x64   : > { %s819_s11 = sshll.u32 %s682_s27, 4  ;;  %s195_s11 = int_to_ptr.vmem [resolvable:$true] %s819_s11 }
  0x67   : > { %s164_s30 = scalar_lea.hbm %s868_s1, %s163_s7 }
  0x68   : > { %s174_s10 = sshll.u32 %s164_s30, 4  ;;  %s182_s8 = scalar_lea.hbm %s868_s1, %s181_s17  ;;  %s175_s10 = int_to_ptr.hbm [resolvable:$true] %s174_s10 }
  0x69   : > { %s552_s4 = sshra.s32 %s175_s10, 4  ;;  %s553_s4 = int_to_ptr.hbm [resolvable:$true] %s552_s4 }
  0x6a   : > { %s554_s29 = scalar_lea.hbm %s553_s4, 1  ;;  %p557_p1 = scmp.lt.s32.totalorder %s553_s4, %s868_s1 }
  0x6b   : > { %p555_p0 = scmp.ne.s32.totalorder %s553_s4, %s554_s29  ;;  %p558_p2 = scmp.lt.s32.totalorder %s760_s26, %s554_s29 }
  0x6d   : > { %p559_p3 = por %p558_p2, %p557_p1 }
  0x6f   : > { %p560_p5 = pnand %p559_p3, %p555_p0 }
  0x71   : > { %563 = shalt.err (!%p560_p5)  }
  0x72   : > { %179 = dma.hbm_to_vmem [thread:$0]  %s175_s10, 16, %s177_s28, [#allocation3 + $0x6] }
  0x73   : > { %s192_s7 = sshll.u32 %s182_s8, 4  ;;  %s193_s7 = int_to_ptr.hbm [resolvable:$true] %s192_s7 }
  0x74   : > { %s576_s12 = sshra.s32 %s193_s7, 4  ;;  %s577_s12 = int_to_ptr.hbm [resolvable:$true] %s576_s12 }
  0x75   : > { %s578_s3 = scalar_lea.hbm %s577_s12, 1  ;;  %p581_p8 = scmp.lt.s32.totalorder %s577_s12, %s868_s1 }
  0x76   : > { %p579_p7 = scmp.ne.s32.totalorder %s577_s12, %s578_s3  ;;  %p582_p9 = scmp.lt.s32.totalorder %s760_s26, %s578_s3 }
  0x78   : > { %p583_p10 = por %p582_p9, %p581_p8 }
  0x7a   : > { %p584_p11 = pnand %p583_p10, %p579_p7 }
  0x7c   : > { %587 = shalt.err (!%p584_p11)  }
  0x7d   : > { %197 = dma.hbm_to_vmem [thread:$0]  %s193_s7, 16, %s195_s11, [#allocation3 + $0x7] }
  0x7e   : > { %s55_s18 = scalar_lea.vmem [#allocation6], %s744_s24 }
  0x7f   : > { %642 = dma.done.wait [#allocation3], 16 }
  0x80   : > { %643 = vsyncadd [#allocation3], 4294967280 }
  0x81   : > { %644 = dma.done.wait [#allocation3 + $0x1], 16 }
  0x82   : > { %645 = vsyncadd [#allocation3 + $0x1], 4294967280 }
  0x83   : > { %646 = dma.done.wait [#allocation3 + $0x2], 16 }
  0x84   : > { %647 = vsyncadd [#allocation3 + $0x2], 4294967280 }
  0x85   : > { %648 = dma.done.wait [#allocation3 + $0x3], 16 }
  0x86   : > { %649 = vsyncadd [#allocation3 + $0x3], 4294967280 }
  0x87   : > { %650 = dma.done.wait [#allocation3 + $0x4], 16 }
  0x88   : > { %651 = vsyncadd [#allocation3 + $0x4], 4294967280 }
  0x89   : > { %652 = dma.done.wait [#allocation3 + $0x5], 16 }
  0x8a   : > { %653 = vsyncadd [#allocation3 + $0x5], 4294967280 }
  0x8b   : > { %654 = dma.done.wait [#allocation3 + $0x6], 16 }
  0x8c   : > { %655 = vsyncadd [#allocation3 + $0x6], 4294967280 }
  0x8d   : > { %656 = dma.done.wait [#allocation3 + $0x7], 16 }
  0x8e   : > { %657 = vsyncadd [#allocation3 + $0x7], 4294967280  ;;  %s228_s24 = scalar_lea.hbm %s869_s2, %s740_s23  ;;  %s230_s11 = sshll.u32 %s55_s18, 4  ;;  %v215_v0 = vld [vmem:[#allocation2] sm:$0xff]  ;;  %s231_s11 = int_to_ptr.vmem [resolvable:$true] %s230_s11 }
  0x8f   : > { %s232_s9 = sshll.u32 %s228_s24, 4  ;;  %216 = vst [vmem:[%s55_s18] sm:$0xff] %v215_v0  ;;  %s218_s30 = scalar_lea.sflag [#allocation7], %s53_s22  ;;  %s233_s9 = int_to_ptr.hbm [resolvable:$true] %s232_s9 }
  0x90   : > { %s614_s10 = sshra.s32 %s233_s9, 4  ;;  %s620_s4 = scalar_lea.hbm %s869_s2, 16  ;;  %s615_s10 = int_to_ptr.hbm [resolvable:$true] %s614_s10 }
  0x91   : > { %s616_s0 = scalar_lea.hbm %s615_s10, 8  ;;  %p621_p1 = scmp.lt.s32.totalorder %s615_s10, %s869_s2 }
  0x92   : > { %p617_p12 = scmp.ne.s32.totalorder %s615_s10, %s616_s0  ;;  %p622_p2 = scmp.lt.s32.totalorder %s620_s4, %s616_s0 }
  0x94   : > { %p618_p13 = pnand %p617_p12, %p729_p4  ;;  %p623_p3 = por %p622_p2, %p621_p1 }
  0x96   : > { %p619_p0 = pneg %p618_p13 }
  0x98   : > { %p624_p5 = pnand %p623_p3, %p619_p0 }
  0x9a   : > { %627 = shalt.err (!%p624_p5)
}
  0x9b   : > { %356 = dma.vmem_to_hbm [thread:$0]  (%p729_p4), %s231_s11, 128, %s233_s9, %s218_s30  }
  0x9c PF: > { %p362_p7 = scmp.ge.s32.totalorder %s672_s15, 1  ;;  %s244_s22 = sand.u32 1, %s664_s13  }
  0x9d   : > { %s245_s25 = scalar_lea.sflag [#allocation7], %s244_s22 }
  0x9e   : > { %p359_p8 = pnand %p362_p7, %p733_p6 }
  0xa0   : > { %p360_p9 = pneg %p359_p8 }
  0xa2   : > { %659 = dma.done.wait (%p360_p9), %s245_s25, 128  }
  0xa3   : > { %661 = vsyncadd (%p360_p9), %s245_s25, 4294967168  ;;  %p20_p10 = scmp.ge.s32.totalorder %s718_s16, 3   ;;  %s872_s13 = smov %s668_s14 }
  0xa4   : > { %s873_s14 = smov %s727_s19  ;;  %s874_s15 = smov %s718_s16 }
  0xa5   :  { %22 = sbr.rel (!%p20_p10) target bundleno = 9 (0x9), region = 105 }
  0xaa   :  { %251 = vsyncpa [#allocation7], 1 }
  0xab   :  { %253 = vsyncpa [#allocation7 + $0x1], 1 }
  0xac   :  { %254 = vsyncmov [#allocation3] }
  0xaf   :  { %s255_s15 = vpop.sfrf %254 }
  0xb0   :  { %p348_p4 = scmp.ne.s32.totalorder %s255_s15, 0 }
  0xb2   :  { %259 = shalt.err (%p348_p4)  }
  0xb3   :  { %261 = vsyncmov [#allocation3 + $0x1] }
  0xb6   :  { %s262_s20 = vpop.sfrf %261 }
  0xb7   :  { %p349_p6 = scmp.ne.s32.totalorder %s262_s20, 0 }
  0xb9   :  { %266 = shalt.err (%p349_p6)  }
  0xba   :  { %268 = vsyncmov [#allocation3 + $0x2] }
  0xbd   :  { %s269_s21 = vpop.sfrf %268 }
  0xbe   :  { %p350_p11 = scmp.ne.s32.totalorder %s269_s21, 0 }
  0xc0   :  { %273 = shalt.err (%p350_p11)  }
  0xc1   :  { %275 = vsyncmov [#allocation3 + $0x3] }
  0xc4   :  { %s276_s6 = vpop.sfrf %275 }
  0xc5   :  { %p351_p12 = scmp.ne.s32.totalorder %s276_s6, 0 }
  0xc7   :  { %280 = shalt.err (%p351_p12)  }
  0xc8   :  { %282 = vsyncmov [#allocation3 + $0x4] }
  0xcb   :  { %s283_s16 = vpop.sfrf %282 }
  0xcc   :  { %p352_p13 = scmp.ne.s32.totalorder %s283_s16, 0 }
  0xce   :  { %287 = shalt.err (%p352_p13)  }
  0xcf   :  { %289 = vsyncmov [#allocation3 + $0x5] }
  0xd2   :  { %s290_s1 = vpop.sfrf %289 }
  0xd3   :  { %p353_p0 = scmp.ne.s32.totalorder %s290_s1, 0 }
  0xd5   :  { %294 = shalt.err (%p353_p0)  }
  0xd6   :  { %296 = vsyncmov [#allocation3 + $0x6] }
  0xd9   :  { %s297_s2 = vpop.sfrf %296 }
  0xda   :  { %p354_p1 = scmp.ne.s32.totalorder %s297_s2, 0 }
  0xdc   :  { %301 = shalt.err (%p354_p1)  }
  0xdd   :  { %303 = vsyncmov [#allocation3 + $0x7] }
  0xe0   :  { %s304_s13 = vpop.sfrf %303 }
  0xe1   :  { %p355_p2 = scmp.ne.s32.totalorder %s304_s13, 0 }
  0xe3   :  { %308 = shalt.err (%p355_p2)  }

</bundles_post_ra>
